<compile_context>
chip_gen: v7x
topology: tpu7x:2x2x1
jax: 0.10.0
libtpu: 0.0.40
codegen_flags: <defaults>
</compile_context>

<pallas_src>
import jax
import jax.numpy as jnp
from jax.experimental import pallas as pl
from jax.experimental.pallas import tpu as pltpu

IN_DIM = 768 + 1 + 68 + 3 + 14   # 854
HID_DIM = 128
OUT_DIM = 1
DROPOUT_P = 0.5


def _round_up(n, m):
    return ((n + m - 1) // m) * m


def _forward(x, w1, b1, w2_row, b2, mask=None):
    # fc1 on the MXU: bf16 operands, f32 accumulation. K = 854 (unpadded);
    # Mosaic masks the contraction remainder internally.
    h = jnp.dot(x.astype(jnp.bfloat16), w1, preferred_element_type=jnp.float32)
    h = jnp.maximum(h + b1, 0.0)                       # bias + ReLU (f32, VPU)
    if mask is not None:                               # inverted dropout
        h = h * mask
    # fc2 with OUT_DIM == 1: broadcast-multiply + lane reduction (XLU has slack)
    # instead of a [128, 1] MXU push.
    return jnp.sum(h * w2_row, axis=-1, keepdims=True) + b2


def _mlp_kernel_eval(x_ref, w1_ref, b1_ref, w2r_ref, b2_ref, o_ref):
    y = _forward(x_ref[...], w1_ref[...], b1_ref[...], w2r_ref[...], b2_ref[...])
    o_ref[...] = y.astype(o_ref.dtype)
    # TODO(synk): lane-dense (1, tb) output layout skipped -- it needs an
    # in-kernel (tb,1)->(1,tb) relayout and store traffic is negligible next to
    # the x DMA stream.


def _mlp_kernel_train(x_ref, w1_ref, b1_ref, w2r_ref, b2_ref, mask_ref, o_ref):
    y = _forward(x_ref[...], w1_ref[...], b1_ref[...], w2r_ref[...], b2_ref[...],
                 mask_ref[...])
    o_ref[...] = y.astype(o_ref.dtype)


def _pick_tiling(batch, block_b=None):
    """Generation-aware batch tile size and VMEM limit."""
    kind = ""
    try:
        kind = jax.devices()[0].device_kind.lower()
    except Exception:
        pass
    if block_b is None:
        block_b = 2048 if "v5" in kind else 4096        # v5e: smaller tile suffices
    if ("v5" in kind) or ("v6" in kind):
        vmem_limit = 64 << 20                           # 128 MiB physical VMEM
    else:
        vmem_limit = 48 << 20                           # v7x: 64 MiB physical; unknown: conservative
    tb = max(8, min(block_b, _round_up(batch, 8)))
    return tb, vmem_limit


def mlp_forward(x, w1, b1, w2, b2, *, training=False, dropout_p=DROPOUT_P,
                rng_key=None, block_b=None):
    """x: [B, 854] (f32 or bf16). w1: [854,128], b1: [.,128], w2: [128,1], b2: [.,1].
    Returns [B, 1] f32."""
    B, in_dim = x.shape
    assert in_dim == IN_DIM and w1.shape == (IN_DIM, HID_DIM)
    assert w2.shape == (HID_DIM, OUT_DIM)

    # Small / resident operands, prepared once per call (cheap, weight-sized).
    w1_b = w1.astype(jnp.bfloat16)                      # [854, 128], VMEM resident
    b1_f = b1.reshape(1, HID_DIM).astype(jnp.float32)
    w2_row = w2.reshape(1, HID_DIM).astype(jnp.float32)  # OUT_DIM == 1
    b2_f = b2.reshape(1, OUT_DIM).astype(jnp.float32)

    tb, vmem_limit = _pick_tiling(B, block_b)
    grid = (pl.cdiv(B, tb),)

    def resident(shape):
        # Constant index_map -> block never changes; single-buffer to save VMEM.
        return pl.BlockSpec(shape, lambda i: (0, 0), pipeline_mode=pl.Buffered(1))

    in_specs = [
        pl.BlockSpec((tb, IN_DIM), lambda i: (i, 0)),   # x tile (streamed, 2-buffered)
        resident((IN_DIM, HID_DIM)),                    # w1
        resident((1, HID_DIM)),                         # b1
        resident((1, HID_DIM)),                         # w2 row
        resident((1, OUT_DIM)),                         # b2
    ]
    args = [x, w1_b, b1_f, w2_row, b2_f]
    kernel = _mlp_kernel_eval

    apply_dropout = training and dropout_p > 0.0
    if apply_dropout:
        if not dropout_p < 1.0:
            raise ValueError(f"dropout_p must be < 1.0 in training, got {dropout_p}")
        if rng_key is None:
            rng_key = jax.random.PRNGKey(0)
        # Inverted dropout: keep with prob 1-p, scale kept units by 1/(1-p).
        # TODO(synk): RNG stream differs from torch.nn.Dropout; on a real TPU the
        # mask could be drawn in-kernel with pltpu.prng_* (no HBM mask stream),
        # but those primitives do not lower in interpret/CPU mode.
        keep = jax.random.bernoulli(rng_key, 1.0 - dropout_p, (B, HID_DIM))
        mask = keep.astype(jnp.float32) * (1.0 / (1.0 - dropout_p))
        in_specs.append(pl.BlockSpec((tb, HID_DIM), lambda i: (i, 0)))
        args.append(mask)
        kernel = _mlp_kernel_train

    out = pl.pallas_call(
        kernel,
        out_shape=jax.ShapeDtypeStruct((B, OUT_DIM), jnp.float32),
        grid=grid,
        in_specs=in_specs,
        out_specs=pl.BlockSpec((tb, OUT_DIM), lambda i: (i, 0)),
        compiler_params=pltpu.CompilerParams(
            dimension_semantics=("parallel",),          # megacore sharding of batch tiles
            vmem_limit_bytes=vmem_limit,
        ),
    )(*args)
    return out


def init_params(key):
    """Deterministic init matching nn.Linear shapes (stored as [in, out])."""
    k1, k2, k3, k4 = jax.random.split(key, 4)
    bound1 = 1.0 / (IN_DIM ** 0.5)
    bound2 = 1.0 / (HID_DIM ** 0.5)
    w1 = jax.random.uniform(k1, (IN_DIM, HID_DIM), jnp.float32, -bound1, bound1)
    b1 = jax.random.uniform(k2, (1, HID_DIM), jnp.float32, -bound1, bound1)
    w2 = jax.random.uniform(k3, (HID_DIM, OUT_DIM), jnp.float32, -bound2, bound2)
    b2 = jax.random.uniform(k4, (1, OUT_DIM), jnp.float32, -bound2, bound2)
    return w1, b1, w2, b2


if __name__ == "__main__":
    key = jax.random.PRNGKey(0)
    kx, kp, kd = jax.random.split(key, 3)
    w1, b1, w2, b2 = init_params(kp)

    def reference(x, mask=None):
        # Pure-JAX reference with bf16-cast matmul operands (kernel accumulates in f32).
        xb = x.astype(jnp.bfloat16).astype(jnp.float32)
        w1b = w1.astype(jnp.bfloat16).astype(jnp.float32)
        h = jnp.maximum(xb @ w1b + b1.reshape(1, -1), 0.0)
        if mask is not None:
            h = h * mask
        return h @ w2 + b2.reshape(1, -1)

    # 1) eval mode (dropout = identity), single tile.
    batch = 8
    x = jax.random.normal(kx, (batch, IN_DIM), jnp.float32)
    out = jax.block_until_ready(mlp_forward(x, w1, b1, w2, b2, training=False))
    assert out.shape == (batch, OUT_DIM)
    assert jnp.allclose(out, reference(x), atol=2e-3, rtol=2e-3), "eval mismatch"

    # 2) eval mode with a multi-step grid and a ragged tail (B % tb != 0).
    batch2 = 20
    x2 = jax.random.normal(kx, (batch2, IN_DIM), jnp.float32)
    out2 = jax.block_until_ready(
        mlp_forward(x2, w1, b1, w2, b2, training=False, block_b=8))
    assert out2.shape == (batch2, OUT_DIM)
    assert jnp.allclose(out2, reference(x2), atol=2e-3, rtol=2e-3), "tail mismatch"

    # 3) training mode (in-kernel dropout-mask multiply), exact check against the
    #    same Bernoulli mask the wrapper generates.
    out_tr = jax.block_until_ready(
        mlp_forward(x, w1, b1, w2, b2, training=True, rng_key=kd))
    keep = jax.random.bernoulli(kd, 1.0 - DROPOUT_P, (batch, HID_DIM))
    mask = keep.astype(jnp.float32) * (1.0 / (1.0 - DROPOUT_P))
    assert out_tr.shape == (batch, OUT_DIM)
    assert jnp.allclose(out_tr, reference(x, mask), atol=2e-3, rtol=2e-3), "train mismatch"

    print("KERNEL_OK")
</pallas_src>

<mosaic_0001>
module attributes {stable_mosaic.version = 11 : i64} {
  func.func @_mlp_kernel_eval(%arg0: i32, %arg1: memref<8x854xf32, #tpu.memory_space<vmem>>, %arg2: memref<854x128xbf16, #tpu.memory_space<vmem>>, %arg3: memref<1x128xf32, #tpu.memory_space<vmem>>, %arg4: memref<1x128xf32, #tpu.memory_space<vmem>>, %arg5: memref<1x1xf32, #tpu.memory_space<vmem>>, %arg6: memref<8x1xf32, #tpu.memory_space<vmem>>) attributes {dimension_semantics = [#tpu.dimension_semantics<parallel>], iteration_bounds = array<i64: 1>, scalar_prefetch = 0 : i64, scratch_operands = 0 : i64, tpu.core_type = #tpu.core_type<tc>, window_params = [{transform_indices = @transform_0, window_bounds = array<i64: 8, 854>}, {pipeline_mode = #tpu.pipeline_mode<synchronous>, transform_indices = @transform_1, window_bounds = array<i64: 854, 128>}, {pipeline_mode = #tpu.pipeline_mode<synchronous>, transform_indices = @transform_2, window_bounds = array<i64: 1, 128>}, {pipeline_mode = #tpu.pipeline_mode<synchronous>, transform_indices = @transform_3, window_bounds = array<i64: 1, 128>}, {pipeline_mode = #tpu.pipeline_mode<synchronous>, transform_indices = @transform_4, window_bounds = array<i64: 1, 1>}, {transform_indices = @transform_5, window_bounds = array<i64: 8, 1>}]} {
    %c0 = arith.constant 0 : index
    %c0_0 = arith.constant 0 : index
    %0 = vector.load %arg1[%c0, %c0_0] : memref<8x854xf32, #tpu.memory_space<vmem>>, vector<8x854xf32>
    %c0_1 = arith.constant 0 : index
    %c0_2 = arith.constant 0 : index
    %1 = vector.load %arg2[%c0_1, %c0_2] : memref<854x128xbf16, #tpu.memory_space<vmem>>, vector<854x128xbf16>
    %c0_3 = arith.constant 0 : index
    %c0_4 = arith.constant 0 : index
    %2 = vector.load %arg3[%c0_3, %c0_4] : memref<1x128xf32, #tpu.memory_space<vmem>>, vector<1x128xf32>
    %c0_5 = arith.constant 0 : index
    %c0_6 = arith.constant 0 : index
    %3 = vector.load %arg4[%c0_5, %c0_6] : memref<1x128xf32, #tpu.memory_space<vmem>>, vector<1x128xf32>
    %c0_7 = arith.constant 0 : index
    %c0_8 = arith.constant 0 : index
    %4 = vector.load %arg5[%c0_7, %c0_8] : memref<1x1xf32, #tpu.memory_space<vmem>>, vector<1x1xf32>
    %5 = arith.truncf %0 : vector<8x854xf32> to vector<8x854xbf16>
    %cst = arith.constant dense<0.000000e+00> : vector<8x128xf32>
    %6 = tpu.matmul %5, %1, %cst {dimension_numbers = #tpu.dot_dimension_numbers<[1], [0], [0], [1], [0, 0, 1, 1], [], []>} : vector<8x854xbf16>, vector<854x128xbf16>, vector<8x128xf32> -> vector<8x128xf32>
    %7 = vector.broadcast %2 : vector<1x128xf32> to vector<8x128xf32>
    %8 = arith.addf %6, %7 : vector<8x128xf32>
    %cst_9 = arith.constant 0.000000e+00 : f32
    %9 = vector.broadcast %cst_9 : f32 to vector<8x128xf32>
    %10 = arith.maximumf %8, %9 : vector<8x128xf32>
    %11 = vector.broadcast %3 : vector<1x128xf32> to vector<8x128xf32>
    %12 = arith.mulf %10, %11 : vector<8x128xf32>
    %cst_10 = arith.constant dense<0.000000e+00> : vector<8xf32>
    %13 = vector.multi_reduction <add>, %12, %cst_10 [1] : vector<8x128xf32> to vector<8xf32>
    %14 = vector.shape_cast %13 : vector<8xf32> to vector<8x1xf32>
    %15 = vector.broadcast %4 : vector<1x1xf32> to vector<8x1xf32>
    %16 = arith.addf %14, %15 : vector<8x1xf32>
    %c0_11 = arith.constant 0 : index
    %c0_12 = arith.constant 0 : index
    %17 = vector.load %arg6[%c0_11, %c0_12] : memref<8x1xf32, #tpu.memory_space<vmem>>, vector<8x1xf32>
    tpu.vector_store %arg6[%c0_11, %c0_12], %16 {strides = array<i32>} : memref<8x1xf32, #tpu.memory_space<vmem>>, vector<8x1xf32>,
    return
  }
  func.func @transform_0(%arg0: i32) -> (i32, i32) {
    %c0_i32 = arith.constant 0 : i32
    %c0_i32_0 = arith.constant 0 : i32
    return %arg0, %c0_i32 : i32, i32
  }
  func.func @transform_1(%arg0: i32) -> (i32, i32) {
    %c0_i32 = arith.constant 0 : i32
    %c0_i32_0 = arith.constant 0 : i32
    %c0_i32_1 = arith.constant 0 : i32
    return %c0_i32, %c0_i32_0 : i32, i32
  }
  func.func @transform_2(%arg0: i32) -> (i32, i32) {
    %c0_i32 = arith.constant 0 : i32
    %c0_i32_0 = arith.constant 0 : i32
    %c0_i32_1 = arith.constant 0 : i32
    return %c0_i32, %c0_i32_0 : i32, i32
  }
  func.func @transform_3(%arg0: i32) -> (i32, i32) {
    %c0_i32 = arith.constant 0 : i32
    %c0_i32_0 = arith.constant 0 : i32
    %c0_i32_1 = arith.constant 0 : i32
    return %c0_i32, %c0_i32_0 : i32, i32
  }
  func.func @transform_4(%arg0: i32) -> (i32, i32) {
    %c0_i32 = arith.constant 0 : i32
    %c0_i32_0 = arith.constant 0 : i32
    %c0_i32_1 = arith.constant 0 : i32
    return %c0_i32, %c0_i32_0 : i32, i32
  }
  func.func @transform_5(%arg0: i32) -> (i32, i32) {
    %c0_i32 = arith.constant 0 : i32
    %c0_i32_0 = arith.constant 0 : i32
    return %arg0, %c0_i32 : i32, i32
  }
}

</mosaic_0001>

<bundles_post_ra>
// kernel: tpu_custom_call.1
= control target key start
LH: loop header
LB: loop body
LE: loop exit
PB: predicated region body
PF: predicated region fallthrough
CT: control target
= control target key end

     0   :  { %s1027_s0 = inlined_call_operand.hbm [shape: f32[8,854], index: 0, kind: input, shape index: {}]   ;;  %s1028_s1 = inlined_call_operand.hbm [shape: bf16[854,128], index: 1, kind: input, shape index: {}]   ;;  %s1029_s2 = inlined_call_operand.vmem [shape: f32[1,128], index: 2, kind: input, shape index: {}]   ;;  %s1030_s3 = inlined_call_operand.vmem [shape: f32[1,128], index: 3, kind: input, shape index: {}]   ;;  %s1031_s4 = inlined_call_operand.<no memory space> [shape: f32[1,1], index: 4, kind: input, shape index: {}]   ;;  %s1032_s5 = inlined_call_operand.vmem [shape: f32[8,1], index: 5, kind: output, shape index: {}]  }
   0x1   :  { %v10_v0 = vstv %s1031_s4 }
   0x2   :  { %11 = vst [vmem:[#allocation2] sm:$0x1] %v10_v0 }
   0x3   :  { %12 = vsyncpa [#allocation4], 0 }
   0x4   :  { %13 = vsyncpa [#allocation6], 0  ;;  %s948_s20 = smov [#allocation3]   ;;  %s949_s22 = smov [#allocation5]  }
   0x5   :  { %s20_s21 = sshll.u32 %s948_s20, 4  ;;  %s29_s23 = sshll.u32 %s949_s22, 4  ;;  %s21_s21 = int_to_ptr.vmem [resolvable:$true] %s20_s21  ;;  %s987_s23 = int_to_ptr.vmem [resolvable:$true] %s29_s23 }
   0x6   :  { %s900_s26 = scalar_lea.hbm %s1027_s0, 896 }
   0x7   :  { %p901_p0 = scmp.ne.s32.totalorder %s1027_s0, %s900_s26  ;;  %p904_p1 = scmp.lt.u32.totalorder %s900_s26, %s1027_s0 }
   0x9   :  { %p906_p2 = pnand %p904_p1, %p901_p0 }
   0xb   :  { %909 = shalt.err (!%p906_p2)
}
   0xc   :  { %s910_s30 = scalar_lea.vmem %s21_s21, 896  ;;  %p915_p4 = scmp.lt.s32.totalorder %s21_s21, %s21_s21 }
   0xd   :  { %p911_p3 = scmp.ne.s32.totalorder %s21_s21, %s910_s30  ;;  %p916_p5 = scmp.lt.s32.totalorder %s910_s30, %s910_s30 }
   0xf   :  { %p917_p6 = por %p916_p5, %p915_p4 }
  0x11   :  { %p918_p7 = pnand %p917_p6, %p911_p3 }
  0x13   :  { %921 = shalt.err (!%p918_p7)
}
  0x14   :  { %23 = dma.hbm_to_vmem [thread:$0]  %s1027_s0, 896, %s21_s21, [#allocation4]  }
  0x15   :  { %s922_s10 = scalar_lea.hbm %s1028_s1, 6848 }
  0x16   :  { %p923_p8 = scmp.ne.s32.totalorder %s1028_s1, %s922_s10  ;;  %p926_p9 = scmp.lt.u32.totalorder %s922_s10, %s1028_s1 }
  0x18   :  { %p928_p10 = pnand %p926_p9, %p923_p8 }
  0x1a   :  { %931 = shalt.err (!%p928_p10)
}
  0x1b   :  { %s932_s15 = scalar_lea.vmem %s987_s23, 6848  ;;  %p937_p12 = scmp.lt.s32.totalorder %s987_s23, %s987_s23 }
  0x1c   :  { %p933_p11 = scmp.ne.s32.totalorder %s987_s23, %s932_s15  ;;  %p938_p13 = scmp.lt.s32.totalorder %s932_s15, %s932_s15 }
  0x1e   :  { %p939_p0 = por %p938_p13, %p937_p12 }
  0x20   :  { %p940_p1 = pnand %p939_p0, %p933_p11 }
  0x22   :  { %943 = shalt.err (!%p940_p1)
}
  0x23   :  { %s950_s0 = smov 64   ;;  %s951_s16 = smov 4  }
  0x24   :  { %35 = dma.hbm_to_vmem [thread:$0]  %s1028_s1, 6848, %s987_s23, [#allocation6], %s950_s0, %s950_s0, %s951_s16  }
  0x25   :  { %944 = dma.done.wait [#allocation4], 896  }
  0x26   :  { %945 = vsyncadd [#allocation4], 4294966400 }
  0x27   :  { %946 = dma.done.wait [#allocation6], 6848  }
  0x28   :  { %947 = vsyncadd [#allocation6], 4294960448  ;;  %v846_v1 = vld [vmem:[#allocation5 + $0x40] sm:$0xff]   ;;  %v850_v5 = vld [vmem:[#allocation5 + $0x48] sm:$0xff]   ;;  %v952_v45 = vmov 0.0   ;;  %vm953_vm0 = vmmov 0  }
  0x29   :  { %v847_v2 = vld [vmem:[#allocation5] sm:$0xff]   ;;  %751 = vmatprep.subr.bf16.mxu0 %v846_v1  ;;  %v851_v6 = vld [vmem:[#allocation5 + $0x8] sm:$0xff]   ;;  %v854_v9 = vld [vmem:[#allocation5 + $0x50] sm:$0xff]   ;;  %vm504_vm1 = vcmask 1042432   ;;  %vm500_vm2 = vcmask 703488   ;;  %vm685_vm3 = vcmask 7168  }
  0x2a   :  { %v848_v3 = vld [vmem:[#allocation5 + $0xc0] sm:$0xff]   ;;  %752 = vmatpush3.bf16.msra.mxu0 %v847_v2  ;;  %v852_v7 = vld [vmem:[#allocation5 + $0xc8] sm:$0xff]   ;;  %v855_v10 = vld [vmem:[#allocation5 + $0x10] sm:$0xff]  }
  0x2b   :  { %v849_v4 = vld [vmem:[#allocation5 + $0x80] sm:$0xff]   ;;  %773 = vmatprep.subr.bf16.mxu1 %v848_v3  ;;  %753 = vmatprep.subr.bf16.mxu0 %v850_v5  ;;  %v853_v8 = vld [vmem:[#allocation5 + $0x88] sm:$0xff]   ;;  %v856_v11 = vld [vmem:[#allocation5 + $0xd0] sm:$0xff]  }
  0x2c   :  { %774 = vmatpush3.bf16.msra.mxu1 %v849_v4  ;;  %v857_v12 = vld [vmem:[#allocation5 + $0x90] sm:$0xff]   ;;  %v858_v13 = vld [vmem:[#allocation5 + $0x58] sm:$0xff]   ;;  %v862_v17 = vld [vmem:[#allocation5 + $0x60] sm:$0xff]  }
  0x2d   :  { %775 = vmatprep.subr.bf16.mxu1 %v852_v7  ;;  %v859_v14 = vld [vmem:[#allocation5 + $0x18] sm:$0xff]   ;;  %v863_v18 = vld [vmem:[#allocation5 + $0x20] sm:$0xff]   ;;  %v866_v21 = vld [vmem:[#allocation5 + $0x68] sm:$0xff]  }
  0x2e   :  { %754 = vmatpush3.bf16.msra.mxu0 %v851_v6  ;;  %v860_v15 = vld [vmem:[#allocation5 + $0xd8] sm:$0xff]   ;;  %v864_v19 = vld [vmem:[#allocation5 + $0xe0] sm:$0xff]   ;;  %v867_v22 = vld [vmem:[#allocation5 + $0x28] sm:$0xff]  }
  0x2f   :  { %755 = vmatprep.subr.bf16.mxu0 %v854_v9  ;;  %v861_v16 = vld [vmem:[#allocation5 + $0x98] sm:$0xff]   ;;  %v865_v20 = vld [vmem:[#allocation5 + $0xa0] sm:$0xff]   ;;  %v868_v23 = vld [vmem:[#allocation5 + $0xe8] sm:$0xff]  }
  0x30   :  { %776 = vmatpush3.bf16.msra.mxu1 %v853_v8  ;;  %v869_v24 = vld [vmem:[#allocation5 + $0xa8] sm:$0xff]   ;;  %v870_v25 = vld [vmem:[#allocation5 + $0x70] sm:$0xff]   ;;  %v874_v29 = vld [vmem:[#allocation5 + $0x78] sm:$0xff]  }
  0x31   :  { %777 = vmatprep.subr.bf16.mxu1 %v856_v11  ;;  %v871_v26 = vld [vmem:[#allocation5 + $0x30] sm:$0xff]   ;;  %v875_v30 = vld [vmem:[#allocation5 + $0x38] sm:$0xff]   ;;  %v49_v35 = vld [vmem:[#allocation3] sm:$0xff] }
  0x32   :  { %756 = vmatpush3.bf16.msra.mxu0 %v855_v10  ;;  %v872_v27 = vld [vmem:[#allocation5 + $0xf0] sm:$0xff]   ;;  %v876_v31 = vld [vmem:[#allocation5 + $0xf8] sm:$0xff]   ;;  %v166_v36 = vpack.c.bf16 %v49_v35, %v49_v35  ;;  %v878_v37 = vld [vmem:[#allocation5 + $0x140] sm:$0xff]  }
  0x33   :  { %757 = vmatprep.subr.bf16.mxu0 %v858_v13  ;;  %v873_v28 = vld [vmem:[#allocation5 + $0xb0] sm:$0xff]   ;;  %v877_v34 = vld [vmem:[#allocation5 + $0xb8] sm:$0xff]   ;;  %v52_v38 = vld [vmem:[#allocation3 + $0x18] sm:$0xff] }
  0x34   :  { %778 = vmatpush3.bf16.msra.mxu1 %v857_v12  ;;  %v50_v32 = vld [vmem:[#allocation3 + $0x8] sm:$0xff]  ;;  %v169_v39 = vpack.c.bf16 %v52_v38, %v52_v38  ;;  %v879_v40 = vld [vmem:[#allocation5 + $0x100] sm:$0xff]   ;;  %v51_v41 = vld [vmem:[#allocation3 + $0x10] sm:$0xff] }
  0x35   :  { %779 = vmatprep.subr.bf16.mxu1 %v860_v15  ;;  %v167_v33 = vpack.c.bf16 %v50_v32, %v50_v32  ;;  %v168_v42 = vpack.c.bf16 %v51_v41, %v51_v41  ;;  %v880_v43 = vld [vmem:[#allocation5 + $0x148] sm:$0xff]   ;;  %v882_v46 = vld [vmem:[#allocation5 + $0x150] sm:$0xff]   ;;  %v884_v48 = vld [vmem:[#allocation5 + $0x180] sm:$0xff]  }
  0x36   :  { %758 = vmatpush3.bf16.msra.mxu0 %v859_v14  ;;  %580 = vmatprep.mubr.bf16.mxu1 %v169_v39  ;;  %v881_v44 = vld [vmem:[#allocation5 + $0x108] sm:$0xff]   ;;  %v883_v47 = vld [vmem:[#allocation5 + $0x110] sm:$0xff]   ;;  %v885_v49 = vld [vmem:[#allocation5 + $0x158] sm:$0xff]  }
  0x37   :  { %759 = vmatprep.subr.bf16.mxu0 %v862_v17  ;;  %540 = vmatprep.mubr.bf16.mxu0 %v167_v33  ;;  %v887_v50 = vld [vmem:[#allocation5 + $0x188] sm:$0xff]   ;;  %v886_v51 = vld [vmem:[#allocation5 + $0x118] sm:$0xff]   ;;  %v888_v52 = vld [vmem:[#allocation5 + $0x160] sm:$0xff]  }
  0x38   :  { %780 = vmatpush3.bf16.msra.mxu1 %v861_v16  ;;  %v890_v53 = vld [vmem:[#allocation5 + $0x190] sm:$0xff]   ;;  %v889_v54 = vld [vmem:[#allocation5 + $0x120] sm:$0xff]   ;;  %v891_v55 = vld [vmem:[#allocation5 + $0x168] sm:$0xff]  }
  0x39   :  { %781 = vmatprep.subr.bf16.mxu1 %v864_v19  ;;  %v893_v56 = vld [vmem:[#allocation5 + $0x198] sm:$0xff]   ;;  %v892_v57 = vld [vmem:[#allocation5 + $0x128] sm:$0xff]   ;;  %v894_v58 = vld [vmem:[#allocation5 + $0x170] sm:$0xff]  }
  0x3a   :  { %760 = vmatpush3.bf16.msra.mxu0 %v863_v18  ;;  %v896_v59 = vld [vmem:[#allocation5 + $0x1a0] sm:$0xff]   ;;  %v54_v60 = vld [vmem:[#allocation3 + $0x28] sm:$0xff]  ;;  %v899_v62 = vld [vmem:[#allocation5 + $0x1a8] ss:$0 sps:$4 sm:$0x77]  }
  0x3b   :  { %761 = vmatprep.subr.bf16.mxu0 %v866_v21  ;;  %v171_v61 = vpack.c.bf16 %v54_v60, %v54_v60  ;;  %v895_v63 = vld [vmem:[#allocation5 + $0x130] sm:$0xff]   ;;  %v897_v0 = vld [vmem:[#allocation5 + $0x178] sm:$0xff]   ;;  %v506_v2 = vsel %vm504_vm1, %v899_v62, 0  ;;  %v53_v4 = vld [vmem:[#allocation3 + $0x20] sm:$0xff] }
  0x3c   :  { %782 = vmatpush3.bf16.msra.mxu1 %v865_v20  ;;  %v55_v1 = vld [vmem:[#allocation3 + $0x30] sm:$0xff]  ;;  %v170_v6 = vpack.c.bf16 %v53_v4, %v53_v4  ;;  %v693_v8 = vld [vmem:[%s1029_s2] ss:$0 sm:$0xff] }
  0x3d   :  { %783 = vmatprep.subr.bf16.mxu1 %v868_v23  ;;  %v898_v3 = vld [vmem:[#allocation5 + $0x138] sm:$0xff]   ;;  %v172_v5 = vpack.c.bf16 %v55_v1, %v55_v1 }
  0x3e   :  { %762 = vmatpush3.bf16.msra.mxu0 %v867_v22 }
  0x3f   :  { %763 = vmatprep.subr.bf16.mxu0 %v870_v25 }
  0x40   :  { %784 = vmatpush3.bf16.msra.mxu1 %v869_v24 }
  0x41   :  { %785 = vmatprep.subr.bf16.mxu1 %v872_v27 }
  0x42   :  { %764 = vmatpush3.bf16.msra.mxu0 %v871_v26 }
  0x43   :  { %765 = vmatprep.subr.bf16.mxu0 %v874_v29 }
  0x44   :  { %786 = vmatpush3.bf16.msra.mxu1 %v873_v28 }
  0x45   :  { %787 = vmatprep.subr.bf16.mxu1 %v876_v31  ;;  %v749_v31 = vld [vmem:[%s1030_s3] ss:$0 sm:$0xff] }
  0x46   :  { %766 = vmatpush3.bf16.msra.mxu0 %v875_v30 }
  0x47   :  { %795 = vmatprep.subr.bf16.mxu0 %v878_v37 }
  0x48   :  { %788 = vmatpush3.bf16.msra.mxu1 %v877_v34  ;;  %v750_v34 = vld [vmem:[#allocation2] ss:$0 sm:$0xff] }
  0x49   :  { %541 = vmatmul.mubr.bf16.vlgmr.msra.gmra.mrb[0].mxu0 %v166_v36  ;;  %824 = vmatprep.subr.bf16.mxu1 %v952_v45 }
  0x4a   :  { %796 = vmatpush3.bf16.msra.mxu0 %v879_v40  ;;  %620 = vmatprep.mubr.bf16.mxu0 %v171_v61 }
  0x4b   :  { %581 = vmatmul.mubr.bf16.vlgmr.msra.gmra.mrb[0].mxu1 %v168_v42  ;;  %797 = vmatprep.subr.bf16.mxu0 %v880_v43 }
  0x4c   :  { %836 = vmatprep.mubr.msk.bf16.mxu1 %vm953_vm0, %v952_v45  ;;  %825 = vmatpush3.bf16.msra.mxu1 %v884_v48 }
  0x4d   :  { %826 = vmatprep.subr.bf16.mxu1 %v952_v45 }
  0x4e   :  { %798 = vmatpush3.bf16.msra.mxu0 %v881_v44 }
  0x4f   :  { %799 = vmatprep.subr.bf16.mxu0 %v882_v46 }
  0x50   :  { %827 = vmatpush3.bf16.msra.mxu1 %v887_v50 }
  0x51   :  { %828 = vmatprep.subr.bf16.mxu1 %v952_v45 }
  0x52   :  { %800 = vmatpush3.bf16.msra.mxu0 %v883_v47 }
  0x53   :  { %801 = vmatprep.subr.bf16.mxu0 %v885_v49 }
  0x54   :  { %829 = vmatpush3.bf16.msra.mxu1 %v890_v53 }
  0x55   :  { %830 = vmatprep.subr.bf16.mxu1 %v952_v45 }
  0x56   :  { %802 = vmatpush3.bf16.msra.mxu0 %v886_v51 }
  0x57   :  { %803 = vmatprep.subr.bf16.mxu0 %v888_v52 }
  0x58   :  { %831 = vmatpush3.bf16.msra.mxu1 %v893_v56 }
  0x59   :  { %832 = vmatprep.subr.bf16.mxu1 %v952_v45 }
  0x5a   :  { %804 = vmatpush3.bf16.msra.mxu0 %v889_v54 }
  0x5b   :  { %805 = vmatprep.subr.bf16.mxu0 %v891_v55 }
  0x5c   :  { %833 = vmatpush3.bf16.msra.mxu1 %v896_v59 }
  0x5d   :  { %834 = vmatprep.subr.bf16.mxu1 %v952_v45 }
  0x5e   :  { %806 = vmatpush3.bf16.msra.mxu0 %v892_v57 }
  0x5f   :  { %807 = vmatprep.subr.bf16.mxu0 %v894_v58 }
  0x60   :  { %835 = vmatpush3.bf16.msra.mxu1 %v506_v2 }
  0x62   :  { %808 = vmatpush3.bf16.msra.mxu0 %v895_v63 }
  0x63   :  { %809 = vmatprep.subr.bf16.mxu0 %v897_v0  ;;  %837 = vmatmul.mubr.msk.bf16.vlgmr.msra.gmra.mrb[4].mxu1 %vm500_vm2, %v172_v5 }
  0x66   :  { %810 = vmatpush3.bf16.msra.mxu0 %v898_v3 }
  0x69   :  { %621 = vmatmul.mubr.bf16.vlgmr.msra.gmra.mrb[4].mxu0 %v170_v6 }
 0x11c   :  { %v767_v7 = vpop.f32.mrb[0].mxu0 }
 0x11d   :  { %v768_v9 = vpop.f32.mrb[1].mxu0 }
 0x11e   :  { %v769_v10 = vadd.f32 %v768_v9, %v767_v7  ;;  %v770_v11 = vpop.f32.mrb[2].mxu0  ;;  %v789_v12 = vpop.f32.mrb[0].mxu1 }
 0x11f   :  { %v771_v13 = vpop.f32.mrb[3].mxu0  ;;  %v790_v15 = vpop.f32.mrb[1].mxu1 }
 0x120   :  { %v543_v14 = vadd.f32 %v769_v10, %v693_v8  ;;  %v791_v16 = vadd.f32 %v790_v15, %v789_v12  ;;  %v792_v17 = vpop.f32.mrb[2].mxu1 }
 0x121   :  { %v793_v18 = vpop.f32.mrb[3].mxu1 }
 0x122   :  { %v583_v19 = vadd.f32 %v791_v16, %v543_v14 }
 0x136   :  { %v662_v20 = vpop.f32.mrb[4].mxu1 }
 0x137   :  { %v838_v21 = vpop.f32.mrb[5].mxu1 }
 0x138   :  { %v665_v23 = vpop.f32.mrb[6].mxu1 }
 0x139   :  { %v839_v25 = vpop.f32.mrb[7].mxu1 }
 0x13c   :  { %v811_v22 = vpop.f32.mrb[4].mxu0 }
 0x13d   :  { %v812_v24 = vpop.f32.mrb[5].mxu0 }
 0x13e   :  { %v813_v26 = vadd.f32 %v812_v24, %v811_v22  ;;  %v814_v27 = vpop.f32.mrb[6].mxu0 }
 0x13f   :  { %v815_v28 = vpop.f32.mrb[7].mxu0 }
 0x140   :  { %v623_v29 = vadd.f32 %v813_v26, %v583_v19 }
 0x142   :  { %v663_v30 = vadd.f32 %v662_v20, %v623_v29 }
 0x144   :  { %v668_v32 = vmax.f32 %v663_v30, 0.0 }
 0x146   :  { %v675_v33 = vmul.f32 %v749_v31, %v668_v32 }
 0x148   :  { %676 = vadd.xlane.f32.xlu0 %v675_v33 }
 0x1d5   :  { %v677_v35 = vpop.xlane.xlu0 %676 }
 0x1d6   :  { %v684_v36 = vadd.f32 %v750_v34, %v677_v35 }
 0x1d8   :  { %686 = vst.msk [vmem:[%s1032_s5] sm:$0xff] %vm685_vm3, %v684_v36 }
 0x1d9   :  { %691 = vsyncpa [#allocation4], 1 }
 0x1da   :  { %692 = vsyncpa [#allocation6], 1 }

</bundles_post_ra>
